<compile_context>
chip_gen: v7x
topology: tpu7x:2x2x1
jax: 0.10.0
libtpu: 0.0.40
codegen_flags: <defaults>
</compile_context>

<pallas_src>
import jax
import jax.numpy as jnp
from jax.experimental import pallas as pl
from jax.experimental.pallas import tpu as pltpu

BN_EPS = 1e-5
LANE = 128  # every feature axis is padded to the 128-lane vreg width


def classifier_kernel(x_ref, w_ref, pk_ref, o_ref):
    """Fused (Linear -> BatchNorm1d -> ReLU) x2 -> Linear -> sigmoid.

    Whole batch + all parameters live in VMEM; matmuls on the MXU (bf16 in,
    f32 accumulate), BN reductions on the XLU, rsqrt/sigmoid on the EUP.
    """
    # Packed small f32 params: [gamma1 | beta1 | gamma2 | beta2 | b3], 128 each.
    g1 = pk_ref[:, pl.ds(0 * LANE, LANE)]
    be1 = pk_ref[:, pl.ds(1 * LANE, LANE)]
    g2 = pk_ref[:, pl.ds(2 * LANE, LANE)]
    be2 = pk_ref[:, pl.ds(3 * LANE, LANE)]
    b3 = pk_ref[:, pl.ds(4 * LANE, LANE)]

    def bn_relu(h, g, be):
        # Training-mode BatchNorm1d with the affine folded into the
        # normalization.  Two-pass (centered) variance avoids the
        # E[h^2] - mean^2 cancellation issue; all math stays f32.
        mean = jnp.mean(h, axis=0, keepdims=True)
        c = h - mean
        var = jnp.mean(c * c, axis=0, keepdims=True)
        scale = g * jax.lax.rsqrt(var + BN_EPS)          # [1,128], rsqrt -> EUP
        return jnp.maximum(c * scale + be, 0.0)          # ReLU  -> VPU

    x = x_ref[...].astype(jnp.bfloat16)                  # bf16 only at MXU input
    h1 = jnp.dot(x, w_ref[0], preferred_element_type=jnp.float32)
    a1 = bn_relu(h1, g1, be1)
    h2 = jnp.dot(a1.astype(jnp.bfloat16), w_ref[1],
                 preferred_element_type=jnp.float32)
    a2 = bn_relu(h2, g2, be2)
    logits = jnp.dot(a2.astype(jnp.bfloat16), w_ref[2],
                     preferred_element_type=jnp.float32) + b3
    o_ref[...] = jax.nn.sigmoid(logits).astype(o_ref.dtype)   # exp -> EUP


def classifier_forward(x, packed_params, output_dim):
    """x: [B, input_dim] f32 -> [B, output_dim] f32 sigmoid probabilities."""
    w_slab, pk = packed_params
    B, in_dim = x.shape
    x_pad = jnp.pad(x, ((0, 0), (0, LANE - in_dim)))     # lane-dense [B, 128]

    vmem = pl.BlockSpec(memory_space=pltpu.MemorySpace.VMEM)
    out_padded = pl.pallas_call(
        classifier_kernel,
        out_shape=jax.ShapeDtypeStruct((B, LANE), jnp.float32),  # lane-dense slab
        in_specs=[vmem] * 3,
        out_specs=vmem,
    )(x_pad, w_slab, pk)
    return out_padded[:, :output_dim]


def init_params(key, input_dim, layer_sizes, output_dim):
    """PyTorch-style uniform init; returns the natural (unpadded) parameters."""
    dims = [input_dim, *layer_sizes, output_dim]
    lin = []
    for i in range(len(dims) - 1):
        d_in, d_out = dims[i], dims[i + 1]
        key, kw, kb = jax.random.split(key, 3)
        bound = 1.0 / jnp.sqrt(jnp.float32(d_in))
        w = jax.random.uniform(kw, (d_in, d_out), jnp.float32, -bound, bound)
        b = jax.random.uniform(kb, (1, d_out), jnp.float32, -bound, bound)
        lin.append((w, b))
    (w1, b1), (w2, b2), (w3, b3) = lin
    g1 = jnp.ones((1, layer_sizes[0]), jnp.float32)
    be1 = jnp.zeros((1, layer_sizes[0]), jnp.float32)
    g2 = jnp.ones((1, layer_sizes[1]), jnp.float32)
    be2 = jnp.zeros((1, layer_sizes[1]), jnp.float32)
    return (w1, b1, g1, be1, w2, b2, g2, be2, w3, b3)


def prepare_params(params):
    """Drop BN-cancelled biases, pad to 128 lanes, pack weights as one bf16 slab."""
    (w1, b1, g1, be1, w2, b2, g2, be2, w3, b3) = params
    del b1, b2  # exactly cancelled by the training-mode BatchNorm mean subtraction

    def pad2(a):
        return jnp.pad(a, ((0, LANE - a.shape[0]), (0, LANE - a.shape[1])))

    def pad_cols(a):
        return jnp.pad(a, ((0, 0), (0, LANE - a.shape[1])))

    # One lane-dense bf16 weight slab: [3, 128, 128]
    w_slab = jnp.stack([pad2(w1), pad2(w2), pad2(w3)]).astype(jnp.bfloat16)
    # One f32 slab with the small per-feature vectors: [1, 5*128]
    pk = jnp.concatenate(
        [pad_cols(g1), pad_cols(be1), pad_cols(g2), pad_cols(be2), pad_cols(b3)],
        axis=1)
    return (w_slab, pk)


def reference_forward(x, params):
    """Pure-JAX f32 reference with the ORIGINAL parameters (incl. b1/b2)."""
    (w1, b1, g1, be1, w2, b2, g2, be2, w3, b3) = params

    def bn_relu(h, g, be):
        mean = jnp.mean(h, axis=0, keepdims=True)
        var = jnp.mean((h - mean) ** 2, axis=0, keepdims=True)
        return jnp.maximum((h - mean) / jnp.sqrt(var + BN_EPS) * g + be, 0.0)

    h = bn_relu(x @ w1 + b1, g1, be1)
    h = bn_relu(h @ w2 + b2, g2, be2)
    return jax.nn.sigmoid(h @ w3 + b3)


def matched_reference(x, params):
    """Pure-JAX reference that mirrors the kernel's bf16-at-MXU numerics."""
    (w1, _b1, g1, be1, w2, _b2, g2, be2, w3, b3) = params
    bf = jnp.bfloat16

    def bn_relu(h, g, be):
        mean = jnp.mean(h, axis=0, keepdims=True)
        c = h - mean
        var = jnp.mean(c * c, axis=0, keepdims=True)
        return jnp.maximum(c * (g * jax.lax.rsqrt(var + BN_EPS)) + be, 0.0)

    h = bn_relu(jnp.dot(x.astype(bf), w1.astype(bf),
                        preferred_element_type=jnp.float32), g1, be1)
    h = bn_relu(jnp.dot(h.astype(bf), w2.astype(bf),
                        preferred_element_type=jnp.float32), g2, be2)
    logits = jnp.dot(h.astype(bf), w3.astype(bf),
                     preferred_element_type=jnp.float32) + b3
    return jax.nn.sigmoid(logits)


if __name__ == "__main__":
    # Small shapes consistent with the module: a 2-hidden-layer classifier.
    B = 8
    INPUT_DIM = 32
    LAYER_SIZES = (64, 32)
    OUTPUT_DIM = 1

    key = jax.random.PRNGKey(0)
    key, kx = jax.random.split(key)
    x = jax.random.normal(kx, (B, INPUT_DIM), jnp.float32)
    params = init_params(key, INPUT_DIM, LAYER_SIZES, OUTPUT_DIM)
    packed = prepare_params(params)

    out = classifier_forward(x, packed, OUTPUT_DIM)
    out = jax.block_until_ready(out)

    assert out.shape == (B, OUTPUT_DIM)
    assert bool(jnp.all(jnp.isfinite(out)))
    # Tight check vs. a reference using the same bf16-at-MXU numerics.
    ref_match = matched_reference(x, params)
    assert float(jnp.max(jnp.abs(out - ref_match))) < 1e-4
    # Looser check vs. the full-f32 PyTorch-equivalent reference (incl. b1/b2).
    ref_f32 = reference_forward(x, params)
    assert float(jnp.max(jnp.abs(out - ref_f32))) < 5e-3

    print("KERNEL_OK")
</pallas_src>

<mosaic_0001>
module attributes {stable_mosaic.version = 11 : i64} {
  func.func @classifier_kernel(%arg0: memref<8x128xf32, #tpu.memory_space<vmem>>, %arg1: memref<3x128x128xbf16, #tpu.memory_space<vmem>>, %arg2: memref<1x640xf32, #tpu.memory_space<vmem>>, %arg3: memref<8x128xf32, #tpu.memory_space<vmem>>) attributes {dimension_semantics = [], scalar_prefetch = 0 : i64, scratch_operands = 0 : i64, tpu.core_type = #tpu.core_type<tc>} {
    %c0 = arith.constant 0 : index
    %c0_0 = arith.constant 0 : index
    %0 = vector.load %arg2[%c0, %c0_0] : memref<1x640xf32, #tpu.memory_space<vmem>>, vector<1x128xf32>
    %c0_1 = arith.constant 0 : index
    %c128 = arith.constant 128 : index
    %1 = vector.load %arg2[%c0_1, %c128] : memref<1x640xf32, #tpu.memory_space<vmem>>, vector<1x128xf32>
    %c0_2 = arith.constant 0 : index
    %c256 = arith.constant 256 : index
    %2 = vector.load %arg2[%c0_2, %c256] : memref<1x640xf32, #tpu.memory_space<vmem>>, vector<1x128xf32>
    %c0_3 = arith.constant 0 : index
    %c384 = arith.constant 384 : index
    %3 = vector.load %arg2[%c0_3, %c384] : memref<1x640xf32, #tpu.memory_space<vmem>>, vector<1x128xf32>
    %c0_4 = arith.constant 0 : index
    %c512 = arith.constant 512 : index
    %4 = vector.load %arg2[%c0_4, %c512] : memref<1x640xf32, #tpu.memory_space<vmem>>, vector<1x128xf32>
    %c0_5 = arith.constant 0 : index
    %c0_6 = arith.constant 0 : index
    %5 = vector.load %arg0[%c0_5, %c0_6] : memref<8x128xf32, #tpu.memory_space<vmem>>, vector<8x128xf32>
    %6 = arith.truncf %5 : vector<8x128xf32> to vector<8x128xbf16>
    %c0_7 = arith.constant 0 : index
    %c0_8 = arith.constant 0 : index
    %c0_9 = arith.constant 0 : index
    %7 = vector.load %arg1[%c0_7, %c0_8, %c0_9] : memref<3x128x128xbf16, #tpu.memory_space<vmem>>, vector<1x128x128xbf16>
    %8 = vector.shape_cast %7 : vector<1x128x128xbf16> to vector<128x128xbf16>
    %cst = arith.constant dense<0.000000e+00> : vector<8x128xf32>
    %9 = tpu.matmul %6, %8, %cst {dimension_numbers = #tpu.dot_dimension_numbers<[1], [0], [0], [1], [0, 0, 1, 1], [], []>} : vector<8x128xbf16>, vector<128x128xbf16>, vector<8x128xf32> -> vector<8x128xf32>
    %cst_10 = arith.constant dense<0.000000e+00> : vector<128xf32>
    %10 = vector.multi_reduction <add>, %9, %cst_10 [0] : vector<8x128xf32> to vector<128xf32>
    %11 = vector.shape_cast %10 : vector<128xf32> to vector<1x128xf32>
    %cst_11 = arith.constant 8.000000e+00 : f32
    %12 = vector.broadcast %cst_11 : f32 to vector<1x128xf32>
    %13 = arith.divf %11, %12 : vector<1x128xf32>
    %14 = vector.broadcast %13 : vector<1x128xf32> to vector<8x128xf32>
    %15 = arith.subf %9, %14 : vector<8x128xf32>
    %16 = arith.mulf %15, %15 : vector<8x128xf32>
    %cst_12 = arith.constant dense<0.000000e+00> : vector<128xf32>
    %17 = vector.multi_reduction <add>, %16, %cst_12 [0] : vector<8x128xf32> to vector<128xf32>
    %18 = vector.shape_cast %17 : vector<128xf32> to vector<1x128xf32>
    %cst_13 = arith.constant 8.000000e+00 : f32
    %19 = vector.broadcast %cst_13 : f32 to vector<1x128xf32>
    %20 = arith.divf %18, %19 : vector<1x128xf32>
    %cst_14 = arith.constant 9.99999974E-6 : f32
    %21 = vector.broadcast %cst_14 : f32 to vector<1x128xf32>
    %22 = arith.addf %20, %21 : vector<1x128xf32>
    %23 = math.rsqrt %22 : vector<1x128xf32>
    %24 = arith.mulf %0, %23 : vector<1x128xf32>
    %25 = vector.broadcast %24 : vector<1x128xf32> to vector<8x128xf32>
    %26 = arith.mulf %15, %25 : vector<8x128xf32>
    %27 = vector.broadcast %1 : vector<1x128xf32> to vector<8x128xf32>
    %28 = arith.addf %26, %27 : vector<8x128xf32>
    %cst_15 = arith.constant 0.000000e+00 : f32
    %29 = vector.broadcast %cst_15 : f32 to vector<8x128xf32>
    %30 = arith.maximumf %28, %29 : vector<8x128xf32>
    %31 = arith.truncf %30 : vector<8x128xf32> to vector<8x128xbf16>
    %c1 = arith.constant 1 : index
    %c0_16 = arith.constant 0 : index
    %c0_17 = arith.constant 0 : index
    %32 = vector.load %arg1[%c1, %c0_16, %c0_17] : memref<3x128x128xbf16, #tpu.memory_space<vmem>>, vector<1x128x128xbf16>
    %33 = vector.shape_cast %32 : vector<1x128x128xbf16> to vector<128x128xbf16>
    %cst_18 = arith.constant dense<0.000000e+00> : vector<8x128xf32>
    %34 = tpu.matmul %31, %33, %cst_18 {dimension_numbers = #tpu.dot_dimension_numbers<[1], [0], [0], [1], [0, 0, 1, 1], [], []>} : vector<8x128xbf16>, vector<128x128xbf16>, vector<8x128xf32> -> vector<8x128xf32>
    %cst_19 = arith.constant dense<0.000000e+00> : vector<128xf32>
    %35 = vector.multi_reduction <add>, %34, %cst_19 [0] : vector<8x128xf32> to vector<128xf32>
    %36 = vector.shape_cast %35 : vector<128xf32> to vector<1x128xf32>
    %cst_20 = arith.constant 8.000000e+00 : f32
    %37 = vector.broadcast %cst_20 : f32 to vector<1x128xf32>
    %38 = arith.divf %36, %37 : vector<1x128xf32>
    %39 = vector.broadcast %38 : vector<1x128xf32> to vector<8x128xf32>
    %40 = arith.subf %34, %39 : vector<8x128xf32>
    %41 = arith.mulf %40, %40 : vector<8x128xf32>
    %cst_21 = arith.constant dense<0.000000e+00> : vector<128xf32>
    %42 = vector.multi_reduction <add>, %41, %cst_21 [0] : vector<8x128xf32> to vector<128xf32>
    %43 = vector.shape_cast %42 : vector<128xf32> to vector<1x128xf32>
    %cst_22 = arith.constant 8.000000e+00 : f32
    %44 = vector.broadcast %cst_22 : f32 to vector<1x128xf32>
    %45 = arith.divf %43, %44 : vector<1x128xf32>
    %cst_23 = arith.constant 9.99999974E-6 : f32
    %46 = vector.broadcast %cst_23 : f32 to vector<1x128xf32>
    %47 = arith.addf %45, %46 : vector<1x128xf32>
    %48 = math.rsqrt %47 : vector<1x128xf32>
    %49 = arith.mulf %2, %48 : vector<1x128xf32>
    %50 = vector.broadcast %49 : vector<1x128xf32> to vector<8x128xf32>
    %51 = arith.mulf %40, %50 : vector<8x128xf32>
    %52 = vector.broadcast %3 : vector<1x128xf32> to vector<8x128xf32>
    %53 = arith.addf %51, %52 : vector<8x128xf32>
    %cst_24 = arith.constant 0.000000e+00 : f32
    %54 = vector.broadcast %cst_24 : f32 to vector<8x128xf32>
    %55 = arith.maximumf %53, %54 : vector<8x128xf32>
    %56 = arith.truncf %55 : vector<8x128xf32> to vector<8x128xbf16>
    %c2 = arith.constant 2 : index
    %c0_25 = arith.constant 0 : index
    %c0_26 = arith.constant 0 : index
    %57 = vector.load %arg1[%c2, %c0_25, %c0_26] : memref<3x128x128xbf16, #tpu.memory_space<vmem>>, vector<1x128x128xbf16>
    %58 = vector.shape_cast %57 : vector<1x128x128xbf16> to vector<128x128xbf16>
    %cst_27 = arith.constant dense<0.000000e+00> : vector<8x128xf32>
    %59 = tpu.matmul %56, %58, %cst_27 {dimension_numbers = #tpu.dot_dimension_numbers<[1], [0], [0], [1], [0, 0, 1, 1], [], []>} : vector<8x128xbf16>, vector<128x128xbf16>, vector<8x128xf32> -> vector<8x128xf32>
    %60 = vector.broadcast %4 : vector<1x128xf32> to vector<8x128xf32>
    %61 = arith.addf %59, %60 : vector<8x128xf32>
    %62 = arith.negf %61 : vector<8x128xf32>
    %63 = math.exp %62 : vector<8x128xf32>
    %cst_28 = arith.constant 1.000000e+00 : f32
    %64 = vector.broadcast %cst_28 : f32 to vector<8x128xf32>
    %65 = arith.addf %64, %63 : vector<8x128xf32>
    %66 = arith.divf %64, %65 : vector<8x128xf32>
    %c0_29 = arith.constant 0 : index
    %c0_30 = arith.constant 0 : index
    %67 = vector.load %arg3[%c0_29, %c0_30] : memref<8x128xf32, #tpu.memory_space<vmem>>, vector<8x128xf32>
    tpu.vector_store %arg3[%c0_29, %c0_30], %66 {strides = array<i32>} : memref<8x128xf32, #tpu.memory_space<vmem>>, vector<8x128xf32>,
    return
  }
}

</mosaic_0001>

<bundles_post_ra>
// kernel: tpu_custom_call.1
= control target key start
LH: loop header
LB: loop body
LE: loop exit
PB: predicated region body
PF: predicated region fallthrough
CT: control target
= control target key end

     0   :  { %8 = vsyncpa [#allocation3], 0  ;;  %s804_s0 = inlined_call_operand.hbm [shape: f32[8,128], index: 0, kind: input, shape index: {}]   ;;  %s805_s1 = inlined_call_operand.hbm [shape: bf16[3,128,128], index: 1, kind: input, shape index: {}]   ;;  %s806_s2 = inlined_call_operand.vmem [shape: f32[1,640], index: 2, kind: input, shape index: {}]   ;;  %s807_s3 = inlined_call_operand.hbm [shape: f32[8,128], index: 3, kind: output, shape index: {}]  }
   0x1   :  { %9 = vsyncpa [#allocation6], 0 }
   0x2   :  { %10 = vsyncpa [#allocation4], 0  ;;  %s689_s12 = smov [#allocation2]   ;;  %s690_s14 = smov [#allocation5]  }
   0x3   :  { %s17_s13 = sshll.u32 %s689_s12, 4  ;;  %s26_s15 = sshll.u32 %s690_s14, 4  ;;  %s18_s13 = int_to_ptr.vmem [resolvable:$true] %s17_s13  ;;  %s716_s15 = int_to_ptr.vmem [resolvable:$true] %s26_s15 }
   0x4   :  { %s617_s18 = scalar_lea.hbm %s804_s0, 128 }
   0x5   :  { %p618_p0 = scmp.ne.s32.totalorder %s804_s0, %s617_s18  ;;  %p621_p1 = scmp.lt.u32.totalorder %s617_s18, %s804_s0 }
   0x7   :  { %p623_p2 = pnand %p621_p1, %p618_p0 }
   0x9   :  { %626 = shalt.err (!%p623_p2)
}
   0xa   :  { %s627_s23 = scalar_lea.vmem %s18_s13, 128  ;;  %p632_p4 = scmp.lt.s32.totalorder %s18_s13, %s18_s13 }
   0xb   :  { %p628_p3 = scmp.ne.s32.totalorder %s18_s13, %s627_s23  ;;  %p633_p5 = scmp.lt.s32.totalorder %s627_s23, %s627_s23 }
   0xd   :  { %p634_p6 = por %p633_p5, %p632_p4 }
   0xf   :  { %p635_p7 = pnand %p634_p6, %p628_p3 }
  0x11   :  { %638 = shalt.err (!%p635_p7)
}
  0x12   :  { %20 = dma.hbm_to_vmem [thread:$0]  %s804_s0, 128, %s18_s13, [#allocation3]  }
  0x13   :  { %s639_s28 = scalar_lea.hbm %s805_s1, 3072 }
  0x14   :  { %p640_p8 = scmp.ne.s32.totalorder %s805_s1, %s639_s28  ;;  %p643_p9 = scmp.lt.u32.totalorder %s639_s28, %s805_s1 }
  0x16   :  { %p645_p10 = pnand %p643_p9, %p640_p8 }
  0x18   :  { %648 = shalt.err (!%p645_p10)
}
  0x19   :  { %s649_s6 = scalar_lea.vmem %s716_s15, 3072  ;;  %p654_p12 = scmp.lt.s32.totalorder %s716_s15, %s716_s15 }
  0x1a   :  { %p650_p11 = scmp.ne.s32.totalorder %s716_s15, %s649_s6  ;;  %p655_p13 = scmp.lt.s32.totalorder %s649_s6, %s649_s6 }
  0x1c   :  { %p656_p0 = por %p655_p13, %p654_p12 }
  0x1e   :  { %p657_p1 = pnand %p656_p0, %p650_p11 }
  0x20   :  { %660 = shalt.err (!%p657_p1)
}
  0x21   :  { %s691_s0 = smov 64   ;;  %s692_s7 = smov 4  }
  0x22   :  { %32 = dma.hbm_to_vmem [thread:$0]  %s805_s1, 3072, %s716_s15, [#allocation6], %s691_s0, %s691_s0, %s692_s7  }
  0x23   :  { %683 = dma.done.wait [#allocation3], 128  }
  0x24   :  { %684 = vsyncadd [#allocation3], 4294967168 }
  0x25   :  { %685 = dma.done.wait [#allocation6], 3072  }
  0x26   :  { %686 = vsyncadd [#allocation6], 4294964224  ;;  %v693_v0 = vmov 0.0   ;;  %vm694_vm0 = vmmov 0   ;;  %v585_v1 = vld [vmem:[#allocation5] sm:$0xff]   ;;  %v586_v2 = vld [vmem:[#allocation5 + $0x8] sm:$0xff]   ;;  %v174_v40 = vlaneseq }
  0x27   :  { %518 = vmatprep.subr.bf16.mxu0 %v693_v0  ;;  %534 = vmatprep.mubr.msk.bf16.mxu0 %vm694_vm0, %v693_v0  ;;  %v587_v3 = vld [vmem:[#allocation5 + $0x10] sm:$0xff]   ;;  %v588_v4 = vld [vmem:[#allocation5 + $0x18] sm:$0xff]   ;;  %v589_v5 = vld [vmem:[#allocation5 + $0x20] sm:$0xff]   ;;  %s695_s19 = smov [#allocation7]  }
  0x28   :  { %538 = vmatprep.subr.bf16.mxu1 %v693_v0  ;;  %554 = vmatprep.mubr.msk.bf16.mxu1 %vm694_vm0, %v693_v0  ;;  %v590_v6 = vld [vmem:[#allocation5 + $0x28] sm:$0xff]   ;;  %v591_v7 = vld [vmem:[#allocation5 + $0x30] sm:$0xff]   ;;  %v592_v8 = vld [vmem:[#allocation5 + $0x38] sm:$0xff]   ;;  %v175_v41 = vshrl.u32 %v174_v40, 7  ;;  %s453_s20 = sshll.u32 %s695_s19, 4  ;;  %s454_s20 = int_to_ptr.vmem [resolvable:$true] %s453_s20 }
  0x29   :  { %519 = vmatpush3.bf16.msra.mxu0 %v585_v1  ;;  %v47_v9 = vld [vmem:[#allocation2] sm:$0xff]  ;;  %v593_v11 = vld [vmem:[#allocation5 + $0x40] sm:$0xff]   ;;  %v594_v12 = vld [vmem:[#allocation5 + $0x48] sm:$0xff]   ;;  %s661_s21 = scalar_lea.vmem %s454_s20, 128  ;;  %p666_p3 = scmp.lt.s32.totalorder %s454_s20, %s454_s20 }
  0x2a   :  { %520 = vmatprep.subr.bf16.mxu0 %v693_v0  ;;  %v48_v10 = vpack.c.bf16 %v47_v9, %v47_v9  ;;  %539 = vmatpush3.bf16.msra.mxu1 %v593_v11  ;;  %v595_v13 = vld [vmem:[#allocation5 + $0x50] sm:$0xff]   ;;  %v596_v14 = vld [vmem:[#allocation5 + $0x58] sm:$0xff]   ;;  %v597_v15 = vld [vmem:[#allocation5 + $0x60] sm:$0xff]   ;;  %v176_v43 = vsub.s32 0, %v175_v41  ;;  %p662_p2 = scmp.ne.s32.totalorder %s454_s20, %s661_s21  ;;  %p667_p4 = scmp.lt.s32.totalorder %s661_s21, %s661_s21 }
  0x2b   :  { %540 = vmatprep.subr.bf16.mxu1 %v693_v0  ;;  %v598_v16 = vld [vmem:[#allocation5 + $0x68] sm:$0xff]   ;;  %v599_v17 = vld [vmem:[#allocation5 + $0x70] sm:$0xff]   ;;  %v600_v18 = vld [vmem:[#allocation5 + $0x78] sm:$0xff]  }
  0x2c   :  { %v42_v42 = vld [vmem:[%s806_s2] sm:$0x1]  ;;  %v471_v47 = vld [vmem:[%s806_s2 + $0x1] ss:$0 sm:$0xff]  ;;  %v601_v52 = vld [vmem:[#allocation5 + $0x80] sm:$0xff]   ;;  %p668_p5 = por %p667_p4, %p666_p3 }
  0x2d   :  { %521 = vmatpush3.bf16.msra.mxu0 %v586_v2  ;;  %v602_v53 = vld [vmem:[#allocation5 + $0x88] sm:$0xff]   ;;  %v603_v54 = vld [vmem:[#allocation5 + $0x90] sm:$0xff]   ;;  %v604_v55 = vld [vmem:[#allocation5 + $0x98] sm:$0xff]  }
  0x2e   :  { %522 = vmatprep.subr.bf16.mxu0 %v693_v0  ;;  %541 = vmatpush3.bf16.msra.mxu1 %v594_v12  ;;  %v605_v56 = vld [vmem:[#allocation5 + $0xa0] sm:$0xff]   ;;  %v606_v57 = vld [vmem:[#allocation5 + $0xa8] sm:$0xff]   ;;  %v607_v58 = vld [vmem:[#allocation5 + $0xb0] sm:$0xff]   ;;  %p669_p6 = pnand %p668_p5, %p662_p2 }
  0x2f   :  { %542 = vmatprep.subr.bf16.mxu1 %v693_v0  ;;  %v608_v59 = vld [vmem:[#allocation5 + $0xb8] sm:$0xff]  }
  0x31   :  { %523 = vmatpush3.bf16.msra.mxu0 %v587_v3 }
  0x32   :  { %524 = vmatprep.subr.bf16.mxu0 %v693_v0  ;;  %543 = vmatpush3.bf16.msra.mxu1 %v595_v13 }
  0x33   :  { %544 = vmatprep.subr.bf16.mxu1 %v693_v0 }
  0x35   :  { %525 = vmatpush3.bf16.msra.mxu0 %v588_v4 }
  0x36   :  { %526 = vmatprep.subr.bf16.mxu0 %v693_v0  ;;  %545 = vmatpush3.bf16.msra.mxu1 %v596_v14 }
  0x37   :  { %546 = vmatprep.subr.bf16.mxu1 %v693_v0 }
  0x39   :  { %527 = vmatpush3.bf16.msra.mxu0 %v589_v5 }
  0x3a   :  { %528 = vmatprep.subr.bf16.mxu0 %v693_v0  ;;  %547 = vmatpush3.bf16.msra.mxu1 %v597_v15 }
  0x3b   :  { %548 = vmatprep.subr.bf16.mxu1 %v693_v0 }
  0x3d   :  { %529 = vmatpush3.bf16.msra.mxu0 %v590_v6 }
  0x3e   :  { %530 = vmatprep.subr.bf16.mxu0 %v693_v0  ;;  %549 = vmatpush3.bf16.msra.mxu1 %v598_v16 }
  0x3f   :  { %550 = vmatprep.subr.bf16.mxu1 %v693_v0 }
  0x41   :  { %531 = vmatpush3.bf16.msra.mxu0 %v591_v7 }
  0x42   :  { %532 = vmatprep.subr.bf16.mxu0 %v693_v0  ;;  %551 = vmatpush3.bf16.msra.mxu1 %v599_v17  ;;  %v44_v17 = vld [vmem:[%s806_s2 + $0x2] sm:$0x1] }
  0x43   :  { %552 = vmatprep.subr.bf16.mxu1 %v693_v0 }
  0x45   :  { %533 = vmatpush3.bf16.msra.mxu0 %v592_v8 }
  0x46   :  { %558 = vmatprep.subr.bf16.mxu0 %v693_v0  ;;  %553 = vmatpush3.bf16.msra.mxu1 %v600_v18 }
  0x48   :  { %535 = vmatmul.mubr.bf16.vlgmr.msra.gmra.mrb[0].mxu0 %v48_v10 }
  0x49   :  { %574 = vmatprep.mubr.msk.bf16.mxu0 %vm694_vm0, %v693_v0  ;;  %559 = vmatpush3.bf16.msra.mxu0 %v601_v52 }
  0x4a   :  { %560 = vmatprep.subr.bf16.mxu0 %v693_v0 }
  0x4d   :  { %561 = vmatpush3.bf16.msra.mxu0 %v602_v53 }
  0x4e   :  { %562 = vmatprep.subr.bf16.mxu0 %v693_v0 }
  0x51   :  { %563 = vmatpush3.bf16.msra.mxu0 %v603_v54 }
  0x52   :  { %564 = vmatprep.subr.bf16.mxu0 %v693_v0 }
  0x55   :  { %565 = vmatpush3.bf16.msra.mxu0 %v604_v55 }
  0x56   :  { %566 = vmatprep.subr.bf16.mxu0 %v693_v0 }
  0x59   :  { %567 = vmatpush3.bf16.msra.mxu0 %v605_v56 }
  0x5a   :  { %568 = vmatprep.subr.bf16.mxu0 %v693_v0 }
  0x5d   :  { %569 = vmatpush3.bf16.msra.mxu0 %v606_v57 }
  0x5e   :  { %570 = vmatprep.subr.bf16.mxu0 %v693_v0 }
  0x61   :  { %571 = vmatpush3.bf16.msra.mxu0 %v607_v58 }
  0x62   :  { %572 = vmatprep.subr.bf16.mxu0 %v693_v0 }
  0x65   :  { %573 = vmatpush3.bf16.msra.mxu0 %v608_v59 }
 0x11b   :  { %v147_v19 = vpop.f32.mrb[0].mxu0 }
 0x11c   :  { %v153_v20 = vrot.slane %v147_v19, 4  ;;  %v536_v21 = vpop.f32.mrb[1].mxu0 }
 0x11d   :  { %v150_v22 = vpop.f32.mrb[2].mxu0  ;;  %v480_v21 = vld [vmem:[%s806_s2 + $0x3] ss:$0 sm:$0xff] }
 0x11e   :  { %v154_v23 = vadd.f32 %v153_v20, %v147_v19  ;;  %v537_v24 = vpop.f32.mrb[3].mxu0 }
 0x120   :  { %v155_v25 = vrot.slane %v154_v23, 2 }
 0x122   :  { %v156_v26 = vadd.f32 %v155_v25, %v154_v23 }
 0x124   :  { %v157_v27 = vrot.slane %v156_v26, 1 }
 0x126   :  { %v158_v28 = vadd.f32 %v157_v27, %v156_v26  ;;  %v481_v26 = vld [vmem:[%s806_s2 + $0x4] ss:$0 sm:$0xff] }
 0x128   :  { %v160_v29 = vmul.f32 0.125, %v158_v28 }
 0x12a   :  { %v161_v30 = vsub.f32 %v147_v19, %v160_v29 }
 0x12c   :  { %v162_v31 = vmul.f32 %v161_v30, %v161_v30 }
 0x12e   :  { %v163_v32 = vrot.slane %v162_v31, 4 }
 0x130   :  { %v164_v33 = vadd.f32 %v163_v32, %v162_v31 }
 0x132   :  { %v165_v34 = vrot.slane %v164_v33, 2 }
 0x134   :  { %v166_v35 = vadd.f32 %v165_v34, %v164_v33 }
 0x136   :  { %v167_v36 = vrot.slane %v166_v35, 1 }
 0x138   :  { %v168_v37 = vadd.f32 %v167_v36, %v166_v35 }
 0x13a   :  { %v169_v38 = vmul.f32 0.125, %v168_v37 }
 0x13c   :  { %v170_v39 = vadd.f32 1e-05, %v169_v38 }
 0x13e   :  { %609 = vrsqrt.f32 %v170_v39 }
 0x148   :  { %v610_v44 = vpop.eup %609 }
 0x149   :  { %v172_v45 = vmul.f32 %v610_v44, %v42_v42 }
 0x14b   :  { %v177_v46 = vrot.slane %v172_v45, %v176_v43 }
 0x14d   :  { %v179_v48 = vmul.f32 %v177_v46, %v161_v30 }
 0x14f   :  { %v186_v49 = vadd.f32 %v471_v47, %v179_v48 }
 0x151   :  { %v187_v50 = vmax.f32 %v186_v49, 0.0 }
 0x153   :  { %v188_v51 = vpack.c.bf16 %v187_v50, %v187_v50 }
 0x155   :  { %555 = vmatmul.mubr.bf16.vlgmr.msra.gmra.mrb[0].mxu1 %v188_v51 }
 0x228   :  { %v288_v60 = vpop.f32.mrb[0].mxu1 }
 0x229   :  { %v294_v61 = vrot.slane %v288_v60, 4  ;;  %v556_v62 = vpop.f32.mrb[1].mxu1 }
 0x22a   :  { %v291_v63 = vpop.f32.mrb[2].mxu1 }
 0x22b   :  { %v295_v1 = vadd.f32 %v294_v61, %v288_v60  ;;  %v557_v2 = vpop.f32.mrb[3].mxu1 }
 0x22d   :  { %v296_v3 = vrot.slane %v295_v1, 2 }
 0x22f   :  { %v297_v4 = vadd.f32 %v296_v3, %v295_v1 }
 0x231   :  { %v298_v5 = vrot.slane %v297_v4, 1 }
 0x233   :  { %v299_v6 = vadd.f32 %v298_v5, %v297_v4 }
 0x235   :  { %v300_v7 = vmul.f32 0.125, %v299_v6 }
 0x237   :  { %v301_v8 = vsub.f32 %v288_v60, %v300_v7 }
 0x239   :  { %v302_v9 = vmul.f32 %v301_v8, %v301_v8 }
 0x23b   :  { %v303_v10 = vrot.slane %v302_v9, 4 }
 0x23d   :  { %v304_v11 = vadd.f32 %v303_v10, %v302_v9 }
 0x23f   :  { %v305_v12 = vrot.slane %v304_v11, 2 }
 0x241   :  { %v306_v13 = vadd.f32 %v305_v12, %v304_v11 }
 0x243   :  { %v307_v0 = vrot.slane %v306_v13, 1 }
 0x245   :  { %v308_v14 = vadd.f32 %v307_v0, %v306_v13 }
 0x247   :  { %v309_v15 = vmul.f32 0.125, %v308_v14 }
 0x249   :  { %v310_v16 = vadd.f32 1e-05, %v309_v15 }
 0x24b   :  { %611 = vrsqrt.f32 %v310_v16 }
 0x255   :  { %v612_v18 = vpop.eup %611 }
 0x256   :  { %v312_v19 = vmul.f32 %v612_v18, %v44_v17 }
 0x258   :  { %v317_v20 = vrot.slane %v312_v19, %v176_v43 }
 0x25a   :  { %v319_v22 = vmul.f32 %v317_v20, %v301_v8 }
 0x25c   :  { %v326_v23 = vadd.f32 %v480_v21, %v319_v22 }
 0x25e   :  { %v327_v24 = vmax.f32 %v326_v23, 0.0 }
 0x260   :  { %v328_v25 = vpack.c.bf16 %v327_v24, %v327_v24 }
 0x262   :  { %575 = vmatmul.mubr.bf16.vlgmr.msra.gmra.mrb[4].mxu0 %v328_v25 }
 0x335   :  { %v434_v27 = vpop.f32.mrb[4].mxu0 }
 0x336   :  { %v435_v28 = vadd.f32 %v481_v26, %v434_v27  ;;  %v576_v29 = vpop.f32.mrb[5].mxu0 }
 0x337   :  { %v437_v30 = vpop.f32.mrb[6].mxu0 }
 0x338   :  { %v490_v31 = vmul.f32 -1.442695, %v435_v28  ;;  %v577_v32 = vpop.f32.mrb[7].mxu0 }
 0x33a   :  { %613 = vpow2.f32 %v490_v31 }
 0x344   :  { %v614_v33 = vpop.eup %613 }
 0x345   :  { %v443_v34 = vadd.f32 1.0, %v614_v33 }
 0x347   :  { %615 = vrcp.f32 %v443_v34 }
 0x351   :  { %v616_v35 = vpop.eup %615 }
 0x352   :  { %446 = vst [vmem:[#allocation7] sm:$0xff] %v616_v35 }
 0x353   :  { %672 = shalt.err (!%p669_p6)
}
 0x354   :  { %s673_s23 = scalar_lea.hbm %s807_s3, 128 }
 0x355   :  { %p674_p7 = scmp.ne.s32.totalorder %s807_s3, %s673_s23  ;;  %p677_p8 = scmp.lt.u32.totalorder %s673_s23, %s807_s3 }
 0x357   :  { %p679_p9 = pnand %p677_p8, %p674_p7 }
 0x359   :  { %682 = shalt.err (!%p679_p9)
}
 0x35a   :  { %456 = dma.vmem_to_hbm [thread:$0]  %s454_s20, 128, %s807_s3, [#allocation4]  }
 0x35b   :  { %687 = dma.done.wait [#allocation4], 128  }
 0x35c   :  { %688 = vsyncadd [#allocation4], 4294967168 }
 0x35d   :  { %460 = vsyncpa [#allocation3], 1 }
 0x35e   :  { %461 = vsyncpa [#allocation6], 1 }
 0x35f   :  { %462 = vsyncpa [#allocation4], 1 }

</bundles_post_ra>
